<compile_context>
chip_gen: v6e
topology: v6e:2x2x1
jax: 0.10.0
libtpu: 0.0.40
codegen_flags: <defaults>
</compile_context>

<pallas_src>
import jax
import jax.numpy as jnp
from jax.experimental import pallas as pl
from jax.experimental.pallas import tpu as pltpu

IN_DIM = 28 * 28      # 784
K_PAD = 896           # 7 * 128: lane-aligned contraction dim for layer 1
OUT_DIM = 10
OUT_PAD = 128         # lane-dense output width -> unmasked stores
MAX_TILE_B = 128      # max batch tile per grid step


def mlp5_kernel(x_ref,
                w1_ref, b1_ref,
                w2_ref, b2_ref,
                w3_ref, b3_ref,
                w4_ref, b4_ref,
                w5_ref, b5_ref,
                out_ref):
    """Fused 5-layer MLP forward over one (tile_b, K_PAD) batch tile.

    Weights may be bf16 (MXU fast path); activations are cast to the weight
    dtype immediately before each dot, accumulation is f32, and all
    elementwise work (bias add + ReLU) stays in f32.
    """
    def dense(h, w_ref, b_ref):
        lhs = h.astype(w_ref.dtype)
        y = jnp.dot(lhs, w_ref[...], preferred_element_type=jnp.float32)
        return y + b_ref[...]

    h = x_ref[...]                                   # f32 (tile_b, K_PAD)
    h = jnp.maximum(dense(h, w1_ref, b1_ref), 0.0)
    h = jnp.maximum(dense(h, w2_ref, b2_ref), 0.0)
    h = jnp.maximum(dense(h, w3_ref, b3_ref), 0.0)
    h = jnp.maximum(dense(h, w4_ref, b4_ref), 0.0)
    out_ref[...] = dense(h, w5_ref, b5_ref).astype(out_ref.dtype)


def mnist_5layers_forward(x_nchw, params, *, use_bf16=True, tile_b=None):
    """x_nchw: (B, 1, 28, 28) float32.
    params: weights pre-transposed to (in, out); biases (1, out)."""
    B = x_nchw.shape[0]
    hidden = params["w1"].shape[1]

    # Adaptive batch tile: multiple of 8 sublanes, at most MAX_TILE_B.
    if tile_b is None:
        tile_b = min(MAX_TILE_B, max(8, pl.cdiv(B, 8) * 8))

    # Flatten NCHW -> (B, 784) (same row-major order as torch .view), pad K
    # to 896 and batch up to a multiple of the batch tile.
    x = x_nchw.reshape(B, -1).astype(jnp.float32)
    x = jnp.pad(x, ((0, 0), (0, K_PAD - IN_DIM)))
    b_pad = pl.cdiv(B, tile_b) * tile_b
    if b_pad != B:
        x = jnp.pad(x, ((0, b_pad - B), (0, 0)))

    w_dtype = jnp.bfloat16 if use_bf16 else jnp.float32

    w1 = jnp.pad(params["w1"], ((0, K_PAD - IN_DIM), (0, 0))).astype(w_dtype)
    w2 = params["w2"].astype(w_dtype)
    w3 = params["w3"].astype(w_dtype)
    w4 = params["w4"].astype(w_dtype)
    w5 = jnp.pad(params["w5"], ((0, 0), (0, OUT_PAD - OUT_DIM))).astype(w_dtype)

    b1 = params["b1"].astype(jnp.float32)
    b2 = params["b2"].astype(jnp.float32)
    b3 = params["b3"].astype(jnp.float32)
    b4 = params["b4"].astype(jnp.float32)
    b5 = jnp.pad(params["b5"], ((0, 0), (0, OUT_PAD - OUT_DIM))).astype(jnp.float32)

    const = lambda i: (0, 0)   # weights/biases: same block every tile (resident)
    in_specs = [
        pl.BlockSpec((tile_b, K_PAD), lambda i: (i, 0)),          # x batch tile
        pl.BlockSpec((K_PAD, hidden), const), pl.BlockSpec((1, hidden), const),
        pl.BlockSpec((hidden, hidden), const), pl.BlockSpec((1, hidden), const),
        pl.BlockSpec((hidden, hidden), const), pl.BlockSpec((1, hidden), const),
        pl.BlockSpec((hidden, hidden), const), pl.BlockSpec((1, hidden), const),
        pl.BlockSpec((hidden, OUT_PAD), const), pl.BlockSpec((1, OUT_PAD), const),
    ]
    out_spec = pl.BlockSpec((tile_b, OUT_PAD), lambda i: (i, 0))

    out = pl.pallas_call(
        mlp5_kernel,
        out_shape=jax.ShapeDtypeStruct((b_pad, OUT_PAD), jnp.float32),
        grid=(b_pad // tile_b,),
        in_specs=in_specs,
        out_specs=out_spec,
        compiler_params=pltpu.CompilerParams(
            dimension_semantics=("parallel",)),     # v7x megacore sharding
    )(x, w1, b1, w2, b2, w3, b3, w4, b4, w5, b5)

    return out[:B, :OUT_DIM]


def init_params(key, in_dim=IN_DIM, hidden=128, out_dim=OUT_DIM):
    """nn.Linear-style init: U(-1/sqrt(fan_in), 1/sqrt(fan_in)).
    Weights stored (fan_in, fan_out); biases (1, fan_out)."""
    dims = [(in_dim, hidden), (hidden, hidden), (hidden, hidden),
            (hidden, hidden), (hidden, out_dim)]
    params = {}
    for i, (fin, fout) in enumerate(dims, start=1):
        key, kw, kb = jax.random.split(key, 3)
        bound = 1.0 / (fin ** 0.5)
        params[f"w{i}"] = jax.random.uniform(kw, (fin, fout), jnp.float32,
                                             minval=-bound, maxval=bound)
        params[f"b{i}"] = jax.random.uniform(kb, (1, fout), jnp.float32,
                                             minval=-bound, maxval=bound)
    return params


def reference_forward(x_nchw, params, use_bf16=False):
    """Plain-JAX reference (epsilon_w = epsilon_b = epsilon_a = 0).
    If use_bf16, mirrors the kernel's bf16-dot / f32-accumulate precision."""
    h = x_nchw.reshape(x_nchw.shape[0], -1).astype(jnp.float32)
    for i in range(1, 6):
        w, b = params[f"w{i}"], params[f"b{i}"]
        lhs = h.astype(jnp.bfloat16) if use_bf16 else h
        rhs = w.astype(jnp.bfloat16) if use_bf16 else w
        h = jnp.dot(lhs, rhs, preferred_element_type=jnp.float32) + b
        if i < 5:
            h = jnp.maximum(h, 0.0)
    return h


if __name__ == "__main__":
    key = jax.random.PRNGKey(0)
    key, kx = jax.random.split(key)

    # Small but shape-consistent: MNIST image input (B, 1, 28, 28), hidden=128.
    B, hidden = 8, 128
    x = jax.random.normal(kx, (B, 1, 28, 28), jnp.float32)
    params = init_params(key, in_dim=IN_DIM, hidden=hidden, out_dim=OUT_DIM)

    # f32 path: exact-semantics check against the plain-JAX reference.
    out_f32 = jax.block_until_ready(
        mnist_5layers_forward(x, params, use_bf16=False))
    ref_f32 = reference_forward(x, params, use_bf16=False)
    assert out_f32.shape == (B, OUT_DIM)
    assert jnp.allclose(out_f32, ref_f32, atol=1e-4, rtol=1e-4), \
        "f32 path mismatch vs JAX reference"

    # bf16 fast path (default): compare against a precision-matched reference.
    out_bf16 = jax.block_until_ready(
        mnist_5layers_forward(x, params, use_bf16=True))
    ref_bf16 = reference_forward(x, params, use_bf16=True)
    assert out_bf16.shape == (B, OUT_DIM)
    assert jnp.allclose(out_bf16, ref_bf16, atol=2e-2, rtol=2e-2), \
        "bf16 path mismatch vs precision-matched JAX reference"

    print("KERNEL_OK")
</pallas_src>

<mosaic_0001>
module attributes {stable_mosaic.version = 11 : i64} {
  func.func @mlp5_kernel(%arg0: i32, %arg1: memref<8x896xf32, #tpu.memory_space<vmem>>, %arg2: memref<896x128xf32, #tpu.memory_space<vmem>>, %arg3: memref<1x128xf32, #tpu.memory_space<vmem>>, %arg4: memref<128x128xf32, #tpu.memory_space<vmem>>, %arg5: memref<1x128xf32, #tpu.memory_space<vmem>>, %arg6: memref<128x128xf32, #tpu.memory_space<vmem>>, %arg7: memref<1x128xf32, #tpu.memory_space<vmem>>, %arg8: memref<128x128xf32, #tpu.memory_space<vmem>>, %arg9: memref<1x128xf32, #tpu.memory_space<vmem>>, %arg10: memref<128x128xf32, #tpu.memory_space<vmem>>, %arg11: memref<1x128xf32, #tpu.memory_space<vmem>>, %arg12: memref<8x128xf32, #tpu.memory_space<vmem>>) attributes {dimension_semantics = [#tpu.dimension_semantics<parallel>], iteration_bounds = array<i64: 1>, scalar_prefetch = 0 : i64, scratch_operands = 0 : i64, tpu.core_type = #tpu.core_type<tc>, window_params = [{transform_indices = @transform_0, window_bounds = array<i64: 8, 896>}, {pipeline_mode = #tpu.pipeline_mode<synchronous>, transform_indices = @transform_1, window_bounds = array<i64: 896, 128>}, {pipeline_mode = #tpu.pipeline_mode<synchronous>, transform_indices = @transform_2, window_bounds = array<i64: 1, 128>}, {pipeline_mode = #tpu.pipeline_mode<synchronous>, transform_indices = @transform_3, window_bounds = array<i64: 128, 128>}, {pipeline_mode = #tpu.pipeline_mode<synchronous>, transform_indices = @transform_4, window_bounds = array<i64: 1, 128>}, {pipeline_mode = #tpu.pipeline_mode<synchronous>, transform_indices = @transform_5, window_bounds = array<i64: 128, 128>}, {pipeline_mode = #tpu.pipeline_mode<synchronous>, transform_indices = @transform_6, window_bounds = array<i64: 1, 128>}, {pipeline_mode = #tpu.pipeline_mode<synchronous>, transform_indices = @transform_7, window_bounds = array<i64: 128, 128>}, {pipeline_mode = #tpu.pipeline_mode<synchronous>, transform_indices = @transform_8, window_bounds = array<i64: 1, 128>}, {pipeline_mode = #tpu.pipeline_mode<synchronous>, transform_indices = @transform_9, window_bounds = array<i64: 128, 128>}, {pipeline_mode = #tpu.pipeline_mode<synchronous>, transform_indices = @transform_10, window_bounds = array<i64: 1, 128>}, {transform_indices = @transform_11, window_bounds = array<i64: 8, 128>}]} {
    %c0 = arith.constant 0 : index
    %c0_0 = arith.constant 0 : index
    %0 = vector.load %arg1[%c0, %c0_0] : memref<8x896xf32, #tpu.memory_space<vmem>>, vector<8x896xf32>
    %c0_1 = arith.constant 0 : index
    %c0_2 = arith.constant 0 : index
    %1 = vector.load %arg2[%c0_1, %c0_2] : memref<896x128xf32, #tpu.memory_space<vmem>>, vector<896x128xf32>
    %cst = arith.constant dense<0.000000e+00> : vector<8x128xf32>
    %2 = tpu.matmul %0, %1, %cst {dimension_numbers = #tpu.dot_dimension_numbers<[1], [0], [0], [1], [0, 0, 1, 1], [], []>} : vector<8x896xf32>, vector<896x128xf32>, vector<8x128xf32> -> vector<8x128xf32>
    %c0_3 = arith.constant 0 : index
    %c0_4 = arith.constant 0 : index
    %3 = vector.load %arg3[%c0_3, %c0_4] : memref<1x128xf32, #tpu.memory_space<vmem>>, vector<1x128xf32>
    %4 = vector.broadcast %3 : vector<1x128xf32> to vector<8x128xf32>
    %5 = arith.addf %2, %4 : vector<8x128xf32>
    %cst_5 = arith.constant 0.000000e+00 : f32
    %6 = vector.broadcast %cst_5 : f32 to vector<8x128xf32>
    %7 = arith.maximumf %5, %6 : vector<8x128xf32>
    %c0_6 = arith.constant 0 : index
    %c0_7 = arith.constant 0 : index
    %8 = vector.load %arg4[%c0_6, %c0_7] : memref<128x128xf32, #tpu.memory_space<vmem>>, vector<128x128xf32>
    %cst_8 = arith.constant dense<0.000000e+00> : vector<8x128xf32>
    %9 = tpu.matmul %7, %8, %cst_8 {dimension_numbers = #tpu.dot_dimension_numbers<[1], [0], [0], [1], [0, 0, 1, 1], [], []>} : vector<8x128xf32>, vector<128x128xf32>, vector<8x128xf32> -> vector<8x128xf32>
    %c0_9 = arith.constant 0 : index
    %c0_10 = arith.constant 0 : index
    %10 = vector.load %arg5[%c0_9, %c0_10] : memref<1x128xf32, #tpu.memory_space<vmem>>, vector<1x128xf32>
    %11 = vector.broadcast %10 : vector<1x128xf32> to vector<8x128xf32>
    %12 = arith.addf %9, %11 : vector<8x128xf32>
    %cst_11 = arith.constant 0.000000e+00 : f32
    %13 = vector.broadcast %cst_11 : f32 to vector<8x128xf32>
    %14 = arith.maximumf %12, %13 : vector<8x128xf32>
    %c0_12 = arith.constant 0 : index
    %c0_13 = arith.constant 0 : index
    %15 = vector.load %arg6[%c0_12, %c0_13] : memref<128x128xf32, #tpu.memory_space<vmem>>, vector<128x128xf32>
    %cst_14 = arith.constant dense<0.000000e+00> : vector<8x128xf32>
    %16 = tpu.matmul %14, %15, %cst_14 {dimension_numbers = #tpu.dot_dimension_numbers<[1], [0], [0], [1], [0, 0, 1, 1], [], []>} : vector<8x128xf32>, vector<128x128xf32>, vector<8x128xf32> -> vector<8x128xf32>
    %c0_15 = arith.constant 0 : index
    %c0_16 = arith.constant 0 : index
    %17 = vector.load %arg7[%c0_15, %c0_16] : memref<1x128xf32, #tpu.memory_space<vmem>>, vector<1x128xf32>
    %18 = vector.broadcast %17 : vector<1x128xf32> to vector<8x128xf32>
    %19 = arith.addf %16, %18 : vector<8x128xf32>
    %cst_17 = arith.constant 0.000000e+00 : f32
    %20 = vector.broadcast %cst_17 : f32 to vector<8x128xf32>
    %21 = arith.maximumf %19, %20 : vector<8x128xf32>
    %c0_18 = arith.constant 0 : index
    %c0_19 = arith.constant 0 : index
    %22 = vector.load %arg8[%c0_18, %c0_19] : memref<128x128xf32, #tpu.memory_space<vmem>>, vector<128x128xf32>
    %cst_20 = arith.constant dense<0.000000e+00> : vector<8x128xf32>
    %23 = tpu.matmul %21, %22, %cst_20 {dimension_numbers = #tpu.dot_dimension_numbers<[1], [0], [0], [1], [0, 0, 1, 1], [], []>} : vector<8x128xf32>, vector<128x128xf32>, vector<8x128xf32> -> vector<8x128xf32>
    %c0_21 = arith.constant 0 : index
    %c0_22 = arith.constant 0 : index
    %24 = vector.load %arg9[%c0_21, %c0_22] : memref<1x128xf32, #tpu.memory_space<vmem>>, vector<1x128xf32>
    %25 = vector.broadcast %24 : vector<1x128xf32> to vector<8x128xf32>
    %26 = arith.addf %23, %25 : vector<8x128xf32>
    %cst_23 = arith.constant 0.000000e+00 : f32
    %27 = vector.broadcast %cst_23 : f32 to vector<8x128xf32>
    %28 = arith.maximumf %26, %27 : vector<8x128xf32>
    %c0_24 = arith.constant 0 : index
    %c0_25 = arith.constant 0 : index
    %29 = vector.load %arg10[%c0_24, %c0_25] : memref<128x128xf32, #tpu.memory_space<vmem>>, vector<128x128xf32>
    %cst_26 = arith.constant dense<0.000000e+00> : vector<8x128xf32>
    %30 = tpu.matmul %28, %29, %cst_26 {dimension_numbers = #tpu.dot_dimension_numbers<[1], [0], [0], [1], [0, 0, 1, 1], [], []>} : vector<8x128xf32>, vector<128x128xf32>, vector<8x128xf32> -> vector<8x128xf32>
    %c0_27 = arith.constant 0 : index
    %c0_28 = arith.constant 0 : index
    %31 = vector.load %arg11[%c0_27, %c0_28] : memref<1x128xf32, #tpu.memory_space<vmem>>, vector<1x128xf32>
    %32 = vector.broadcast %31 : vector<1x128xf32> to vector<8x128xf32>
    %33 = arith.addf %30, %32 : vector<8x128xf32>
    %c0_29 = arith.constant 0 : index
    %c0_30 = arith.constant 0 : index
    %34 = vector.load %arg12[%c0_29, %c0_30] : memref<8x128xf32, #tpu.memory_space<vmem>>, vector<8x128xf32>
    tpu.vector_store %arg12[%c0_29, %c0_30], %33 {strides = array<i32>} : memref<8x128xf32, #tpu.memory_space<vmem>>, vector<8x128xf32>,
    return
  }
  func.func @transform_0(%arg0: i32) -> (i32, i32) {
    %c0_i32 = arith.constant 0 : i32
    %c0_i32_0 = arith.constant 0 : i32
    return %arg0, %c0_i32 : i32, i32
  }
  func.func @transform_1(%arg0: i32) -> (i32, i32) {
    %c0_i32 = arith.constant 0 : i32
    %c0_i32_0 = arith.constant 0 : i32
    %c0_i32_1 = arith.constant 0 : i32
    return %c0_i32, %c0_i32_0 : i32, i32
  }
  func.func @transform_2(%arg0: i32) -> (i32, i32) {
    %c0_i32 = arith.constant 0 : i32
    %c0_i32_0 = arith.constant 0 : i32
    %c0_i32_1 = arith.constant 0 : i32
    return %c0_i32, %c0_i32_0 : i32, i32
  }
  func.func @transform_3(%arg0: i32) -> (i32, i32) {
    %c0_i32 = arith.constant 0 : i32
    %c0_i32_0 = arith.constant 0 : i32
    %c0_i32_1 = arith.constant 0 : i32
    return %c0_i32, %c0_i32_0 : i32, i32
  }
  func.func @transform_4(%arg0: i32) -> (i32, i32) {
    %c0_i32 = arith.constant 0 : i32
    %c0_i32_0 = arith.constant 0 : i32
    %c0_i32_1 = arith.constant 0 : i32
    return %c0_i32, %c0_i32_0 : i32, i32
  }
  func.func @transform_5(%arg0: i32) -> (i32, i32) {
    %c0_i32 = arith.constant 0 : i32
    %c0_i32_0 = arith.constant 0 : i32
    %c0_i32_1 = arith.constant 0 : i32
    return %c0_i32, %c0_i32_0 : i32, i32
  }
  func.func @transform_6(%arg0: i32) -> (i32, i32) {
    %c0_i32 = arith.constant 0 : i32
    %c0_i32_0 = arith.constant 0 : i32
    %c0_i32_1 = arith.constant 0 : i32
    return %c0_i32, %c0_i32_0 : i32, i32
  }
  func.func @transform_7(%arg0: i32) -> (i32, i32) {
    %c0_i32 = arith.constant 0 : i32
    %c0_i32_0 = arith.constant 0 : i32
    %c0_i32_1 = arith.constant 0 : i32
    return %c0_i32, %c0_i32_0 : i32, i32
  }
  func.func @transform_8(%arg0: i32) -> (i32, i32) {
    %c0_i32 = arith.constant 0 : i32
    %c0_i32_0 = arith.constant 0 : i32
    %c0_i32_1 = arith.constant 0 : i32
    return %c0_i32, %c0_i32_0 : i32, i32
  }
  func.func @transform_9(%arg0: i32) -> (i32, i32) {
    %c0_i32 = arith.constant 0 : i32
    %c0_i32_0 = arith.constant 0 : i32
    %c0_i32_1 = arith.constant 0 : i32
    return %c0_i32, %c0_i32_0 : i32, i32
  }
  func.func @transform_10(%arg0: i32) -> (i32, i32) {
    %c0_i32 = arith.constant 0 : i32
    %c0_i32_0 = arith.constant 0 : i32
    %c0_i32_1 = arith.constant 0 : i32
    return %c0_i32, %c0_i32_0 : i32, i32
  }
  func.func @transform_11(%arg0: i32) -> (i32, i32) {
    %c0_i32 = arith.constant 0 : i32
    %c0_i32_0 = arith.constant 0 : i32
    return %arg0, %c0_i32 : i32, i32
  }
}

</mosaic_0001>

<bundles_post_ra>
// kernel: tpu_custom_call.1
= control target key start
LH: loop header
LB: loop body
LE: loop exit
PB: predicated region body
PF: predicated region fallthrough
CT: control target
= control target key end

     0   :  { %16 = vsyncpa [#allocation3], 0  ;;  %s1663_s0 = inlined_call_operand.hbm [shape: f32[8,896], index: 0, kind: input, shape index: {}]   ;;  %s1664_s1 = inlined_call_operand.hbm [shape: f32[896,128], index: 1, kind: input, shape index: {}]   ;;  %s1665_s2 = inlined_call_operand.vmem [shape: f32[1,128], index: 2, kind: input, shape index: {}]   ;;  %s1666_s3 = inlined_call_operand.hbm [shape: f32[128,128], index: 3, kind: input, shape index: {}]   ;;  %s1667_s4 = inlined_call_operand.vmem [shape: f32[1,128], index: 4, kind: input, shape index: {}]   ;;  %s1668_s5 = inlined_call_operand.hbm [shape: f32[128,128], index: 5, kind: input, shape index: {}]   ;;  %s1669_s6 = inlined_call_operand.vmem [shape: f32[1,128], index: 6, kind: input, shape index: {}]   ;;  %s1670_s7 = inlined_call_operand.hbm [shape: f32[128,128], index: 7, kind: input, shape index: {}]   ;;  %s1671_s8 = inlined_call_operand.vmem [shape: f32[1,128], index: 8, kind: input, shape index: {}]   ;;  %s1672_s9 = inlined_call_operand.hbm [shape: f32[128,128], index: 9, kind: input, shape index: {}]   ;;  %s1673_s10 = inlined_call_operand.vmem [shape: f32[1,128], index: 10, kind: input, shape index: {}]   ;;  %s1674_s11 = inlined_call_operand.hbm [shape: f32[8,128], index: 11, kind: output, shape index: {}]  }
   0x1   :  { %17 = vsyncpa [#allocation6], 0 }
   0x2   :  { %18 = vsyncpa [#allocation9], 0 }
   0x3   :  { %19 = vsyncpa [#allocation12], 0 }
   0x4   :  { %20 = vsyncpa [#allocation4], 0  ;;  %s1451_s17 = smov [#allocation5]  }
   0x5   :  { %s36_s18 = sshll.u32 %s1451_s17, 4  ;;  %s37_s18 = int_to_ptr.vmem [resolvable:$true] %s36_s18 }
   0x6   :  { %s1309_s19 = scalar_lea.vmem %s37_s18, 14336  ;;  %p1314_p1 = scmp.lt.s32.totalorder %s37_s18, %s37_s18 }
   0x7   :  { %p1310_p0 = scmp.ne.s32.totalorder %s37_s18, %s1309_s19  ;;  %p1315_p2 = scmp.lt.s32.totalorder %s1309_s19, %s1309_s19 }
   0x9   :  { %p1316_p3 = por %p1315_p2, %p1314_p1 }
   0xb   :  { %p1317_p4 = pnand %p1316_p3, %p1310_p0 }
   0xd   :  { %1320 = shalt.err (!%p1317_p4)
}
   0xe   :  { %s1452_s20 = smov 128   ;;  %s1453_s21 = smov 8  }
   0xf   :  { %42 = dma.hbm_to_vmem [thread:$0]  %s1664_s1, 14336, %s37_s18, [#allocation6], %s1452_s20, %s1452_s20, %s1453_s21  }
  0x10   :  { %s1454_s24 = smov [#allocation8]   ;;  %s1455_s26 = smov [#allocation2]  }
  0x11   :  { %s64_s25 = sshll.u32 %s1454_s24, 4  ;;  %s27_s27 = sshll.u32 %s1455_s26, 4  ;;  %s65_s25 = int_to_ptr.vmem [resolvable:$true] %s64_s25  ;;  %s28_s27 = int_to_ptr.vmem [resolvable:$true] %s27_s27 }
  0x12   :  { %s1329_s28 = scalar_lea.vmem %s65_s25, 2048  ;;  %p1334_p6 = scmp.lt.s32.totalorder %s65_s25, %s65_s25 }
  0x13   :  { %p1330_p5 = scmp.ne.s32.totalorder %s65_s25, %s1329_s28  ;;  %p1335_p7 = scmp.lt.s32.totalorder %s1329_s28, %s1329_s28 }
  0x15   :  { %p1336_p8 = por %p1335_p7, %p1334_p6 }
  0x17   :  { %p1337_p9 = pnand %p1336_p8, %p1330_p5 }
  0x19   :  { %1340 = shalt.err (!%p1337_p9)
}
  0x1a   :  { %70 = dma.hbm_to_vmem [thread:$0]  %s1668_s5, 2048, %s65_s25, [#allocation9], %s1452_s20, %s1452_s20, %s1453_s21  }
  0x1b   :  { %s1349_s1 = scalar_lea.vmem %s28_s27, 896  ;;  %p1354_p11 = scmp.lt.s32.totalorder %s28_s27, %s28_s27 }
  0x1c   :  { %p1350_p10 = scmp.ne.s32.totalorder %s28_s27, %s1349_s1  ;;  %p1355_p12 = scmp.lt.s32.totalorder %s1349_s1, %s1349_s1 }
  0x1e   :  { %p1356_p13 = por %p1355_p12, %p1354_p11 }
  0x20   :  { %p1357_p0 = pnand %p1356_p13, %p1350_p10 }
  0x22   :  { %1360 = shalt.err (!%p1357_p0)
}
  0x23   :  { %30 = dma.hbm_to_vmem [thread:$0]  %s1663_s0, 896, %s28_s27, [#allocation3]  }
  0x24   :  { %s1456_s14 = smov [#allocation7]   ;;  %s1457_s16 = smov [#allocation10]  }
  0x25   :  { %s50_s15 = sshll.u32 %s1456_s14, 4  ;;  %s78_s17 = sshll.u32 %s1457_s16, 4  ;;  %s51_s15 = int_to_ptr.vmem [resolvable:$true] %s50_s15  ;;  %s79_s17 = int_to_ptr.vmem [resolvable:$true] %s78_s17 }
  0x26   :  { %s1369_s18 = scalar_lea.vmem %s51_s15, 2048  ;;  %p1374_p2 = scmp.lt.s32.totalorder %s51_s15, %s51_s15 }
  0x27   :  { %p1370_p1 = scmp.ne.s32.totalorder %s51_s15, %s1369_s18  ;;  %p1375_p3 = scmp.lt.s32.totalorder %s1369_s18, %s1369_s18 }
  0x29   :  { %p1376_p4 = por %p1375_p3, %p1374_p2 }
  0x2b   :  { %p1377_p5 = pnand %p1376_p4, %p1370_p1 }
  0x2d   :  { %1380 = shalt.err (!%p1377_p5)
}
  0x2e   :  { %56 = dma.hbm_to_vmem [thread:$0]  %s1666_s3, 2048, %s51_s15, [#allocation6], %s1452_s20, %s1452_s20, %s1453_s21  }
  0x2f   :  { %s1389_s0 = scalar_lea.vmem %s79_s17, 2048  ;;  %p1394_p7 = scmp.lt.s32.totalorder %s79_s17, %s79_s17 }
  0x30   :  { %p1390_p6 = scmp.ne.s32.totalorder %s79_s17, %s1389_s0  ;;  %p1395_p8 = scmp.lt.s32.totalorder %s1389_s0, %s1389_s0 }
  0x32   :  { %p1396_p9 = por %p1395_p8, %p1394_p7 }
  0x34   :  { %p1397_p10 = pnand %p1396_p9, %p1390_p6 }
  0x36   :  { %1400 = shalt.err (!%p1397_p10)
}
  0x37   :  { %84 = dma.hbm_to_vmem [thread:$0]  %s1670_s7, 2048, %s79_s17, [#allocation9], %s1452_s20, %s1452_s20, %s1453_s21  }
  0x38   :  { %s1458_s24 = smov [#allocation11]  }
  0x39   :  { %s92_s25 = sshll.u32 %s1458_s24, 4  ;;  %s93_s25 = int_to_ptr.vmem [resolvable:$true] %s92_s25 }
  0x3a   :  { %s1409_s26 = scalar_lea.vmem %s93_s25, 2048  ;;  %p1414_p12 = scmp.lt.s32.totalorder %s93_s25, %s93_s25 }
  0x3b   :  { %p1410_p11 = scmp.ne.s32.totalorder %s93_s25, %s1409_s26  ;;  %p1415_p13 = scmp.lt.s32.totalorder %s1409_s26, %s1409_s26 }
  0x3d   :  { %p1416_p0 = por %p1415_p13, %p1414_p12 }
  0x3f   :  { %p1417_p1 = pnand %p1416_p0, %p1410_p11 }
  0x41   :  { %1420 = shalt.err (!%p1417_p1)
}
  0x42   :  { %98 = dma.hbm_to_vmem [thread:$0]  %s1672_s9, 2048, %s93_s25, [#allocation12], %s1452_s20, %s1452_s20, %s1453_s21  }
  0x43   :  { %1441 = dma.done.wait [#allocation3], 896  }
  0x44   :  { %1442 = vsyncadd [#allocation3], 4294966400 }
  0x45   :  { %1443 = dma.done.wait [#allocation6], 16384  }
  0x46   :  { %1444 = vsyncadd [#allocation6], 4294950912 }
  0x47   :  { %1445 = dma.done.wait [#allocation9], 4096  }
  0x48   :  { %1446 = vsyncadd [#allocation9], 4294963200 }
  0x49   :  { %1447 = dma.done.wait [#allocation12], 2048  }
  0x4a   :  { %1448 = vsyncadd [#allocation12], 4294965248  ;;  %v157_v0 = vld [vmem:[#allocation5 + $0xf8] sm:$0xff]  ;;  %v156_v2 = vld [vmem:[#allocation5 + $0xf0] sm:$0xff]  ;;  %vm1460_vm0 = vmmov 0   ;;  %s1461_s1 = smov [#allocation13]  }
  0x4b   :  { %v141_v1 = vld [vmem:[#allocation5 + $0x78] sm:$0xff]  ;;  %925 = vmatprep.subr.mxu0 %v157_v0  ;;  %v140_v4 = vld [vmem:[#allocation5 + $0x70] sm:$0xff]  ;;  %v155_v6 = vld [vmem:[#allocation5 + $0xe8] sm:$0xff]  ;;  %s908_s12 = sshll.u32 %s1461_s1, 4  ;;  %s909_s12 = int_to_ptr.vmem [resolvable:$true] %s908_s12 }
  0x4c   :  { %v189_v3 = vld [vmem:[#allocation5 + $0x1f8] sm:$0xff]  ;;  %926 = vmatpush3.msra.mxu0 %v141_v1  ;;  %v188_v7 = vld [vmem:[#allocation5 + $0x1f0] sm:$0xff]  ;;  %v139_v8 = vld [vmem:[#allocation5 + $0x68] sm:$0xff]  ;;  %s1421_s13 = scalar_lea.vmem %s909_s12, 128  ;;  %p1426_p3 = scmp.lt.s32.totalorder %s909_s12, %s909_s12 }
  0x4d   :  { %v173_v5 = vld [vmem:[#allocation5 + $0x178] sm:$0xff]  ;;  %960 = vmatprep.subr.mxu1 %v189_v3  ;;  %927 = vmatprep.subr.mxu0 %v156_v2  ;;  %v172_v9 = vld [vmem:[#allocation5 + $0x170] sm:$0xff]  ;;  %v187_v10 = vld [vmem:[#allocation5 + $0x1e8] sm:$0xff]  ;;  %p1422_p2 = scmp.ne.s32.totalorder %s909_s12, %s1421_s13  ;;  %p1427_p4 = scmp.lt.s32.totalorder %s1421_s13, %s1421_s13 }
  0x4e   :  { %961 = vmatpush3.msra.mxu1 %v173_v5  ;;  %928 = vmatpush3.msra.mxu0 %v140_v4  ;;  %v154_v11 = vld [vmem:[#allocation5 + $0xe0] sm:$0xff]  ;;  %v171_v12 = vld [vmem:[#allocation5 + $0x168] sm:$0xff]  ;;  %v153_v15 = vld [vmem:[#allocation5 + $0xd8] sm:$0xff] }
  0x4f   :  { %962 = vmatprep.subr.mxu1 %v188_v7  ;;  %929 = vmatprep.subr.mxu0 %v155_v6  ;;  %v138_v13 = vld [vmem:[#allocation5 + $0x60] sm:$0xff]  ;;  %v137_v17 = vld [vmem:[#allocation5 + $0x58] sm:$0xff]  ;;  %v152_v19 = vld [vmem:[#allocation5 + $0xd0] sm:$0xff]  ;;  %p1428_p5 = por %p1427_p4, %p1426_p3 }
  0x50   :  { %963 = vmatpush3.msra.mxu1 %v172_v9  ;;  %v186_v14 = vld [vmem:[#allocation5 + $0x1e0] sm:$0xff]  ;;  %930 = vmatpush3.msra.mxu0 %v139_v8  ;;  %v185_v18 = vld [vmem:[#allocation5 + $0x1d8] sm:$0xff]  ;;  %v136_v21 = vld [vmem:[#allocation5 + $0x50] sm:$0xff] }
  0x51   :  { %964 = vmatprep.subr.mxu1 %v187_v10  ;;  %v170_v16 = vld [vmem:[#allocation5 + $0x160] sm:$0xff]  ;;  %931 = vmatprep.subr.mxu0 %v154_v11  ;;  %v169_v20 = vld [vmem:[#allocation5 + $0x158] sm:$0xff]  ;;  %v184_v22 = vld [vmem:[#allocation5 + $0x1d0] sm:$0xff]  ;;  %v1459_v11 = vmov 0.0   ;;  %p1429_p6 = pnand %p1428_p5, %p1422_p2 }
  0x52   :  { %965 = vmatpush3.msra.mxu1 %v171_v12  ;;  %932 = vmatpush3.msra.mxu0 %v138_v13  ;;  %v151_v23 = vld [vmem:[#allocation5 + $0xc8] sm:$0xff]  ;;  %v168_v24 = vld [vmem:[#allocation5 + $0x150] sm:$0xff]  ;;  %v150_v27 = vld [vmem:[#allocation5 + $0xc0] sm:$0xff] }
  0x53   :  { %966 = vmatprep.subr.mxu1 %v186_v14  ;;  %933 = vmatprep.subr.mxu0 %v153_v15  ;;  %v135_v25 = vld [vmem:[#allocation5 + $0x48] sm:$0xff]  ;;  %v134_v29 = vld [vmem:[#allocation5 + $0x40] sm:$0xff]  ;;  %v149_v31 = vld [vmem:[#allocation5 + $0xb8] sm:$0xff] }
  0x54   :  { %967 = vmatpush3.msra.mxu1 %v170_v16  ;;  %934 = vmatpush3.msra.mxu0 %v137_v17  ;;  %v183_v26 = vld [vmem:[#allocation5 + $0x1c8] sm:$0xff]  ;;  %v182_v30 = vld [vmem:[#allocation5 + $0x1c0] sm:$0xff]  ;;  %v133_v33 = vld [vmem:[#allocation5 + $0x38] sm:$0xff] }
  0x55   :  { %968 = vmatprep.subr.mxu1 %v185_v18  ;;  %935 = vmatprep.subr.mxu0 %v152_v19  ;;  %v167_v28 = vld [vmem:[#allocation5 + $0x148] sm:$0xff]  ;;  %v166_v32 = vld [vmem:[#allocation5 + $0x140] sm:$0xff]  ;;  %v181_v34 = vld [vmem:[#allocation5 + $0x1b8] sm:$0xff] }
  0x56   :  { %969 = vmatpush3.msra.mxu1 %v169_v20  ;;  %936 = vmatpush3.msra.mxu0 %v136_v21  ;;  %v148_v35 = vld [vmem:[#allocation5 + $0xb0] sm:$0xff]  ;;  %v165_v36 = vld [vmem:[#allocation5 + $0x138] sm:$0xff]  ;;  %v147_v39 = vld [vmem:[#allocation5 + $0xa8] sm:$0xff] }
  0x57   :  { %970 = vmatprep.subr.mxu1 %v184_v22  ;;  %937 = vmatprep.subr.mxu0 %v151_v23  ;;  %v132_v37 = vld [vmem:[#allocation5 + $0x30] sm:$0xff]  ;;  %v131_v41 = vld [vmem:[#allocation5 + $0x28] sm:$0xff]  ;;  %v146_v43 = vld [vmem:[#allocation5 + $0xa0] sm:$0xff] }
  0x58   :  { %971 = vmatpush3.msra.mxu1 %v168_v24  ;;  %938 = vmatpush3.msra.mxu0 %v135_v25  ;;  %v180_v38 = vld [vmem:[#allocation5 + $0x1b0] sm:$0xff]  ;;  %v179_v42 = vld [vmem:[#allocation5 + $0x1a8] sm:$0xff]  ;;  %v130_v45 = vld [vmem:[#allocation5 + $0x20] sm:$0xff] }
  0x59   :  { %972 = vmatprep.subr.mxu1 %v183_v26  ;;  %939 = vmatprep.subr.mxu0 %v150_v27  ;;  %v164_v40 = vld [vmem:[#allocation5 + $0x130] sm:$0xff]  ;;  %v163_v44 = vld [vmem:[#allocation5 + $0x128] sm:$0xff]  ;;  %v178_v46 = vld [vmem:[#allocation5 + $0x1a0] sm:$0xff] }
  0x5a   :  { %973 = vmatpush3.msra.mxu1 %v167_v28  ;;  %940 = vmatpush3.msra.mxu0 %v134_v29  ;;  %v145_v47 = vld [vmem:[#allocation5 + $0x98] sm:$0xff]  ;;  %v162_v48 = vld [vmem:[#allocation5 + $0x120] sm:$0xff]  ;;  %v144_v51 = vld [vmem:[#allocation5 + $0x90] sm:$0xff] }
  0x5b   :  { %974 = vmatprep.subr.mxu1 %v182_v30  ;;  %941 = vmatprep.subr.mxu0 %v149_v31  ;;  %v129_v49 = vld [vmem:[#allocation5 + $0x18] sm:$0xff]  ;;  %v128_v53 = vld [vmem:[#allocation5 + $0x10] sm:$0xff]  ;;  %v143_v55 = vld [vmem:[#allocation5 + $0x88] sm:$0xff] }
  0x5c   :  { %975 = vmatpush3.msra.mxu1 %v166_v32  ;;  %942 = vmatpush3.msra.mxu0 %v133_v33  ;;  %v177_v50 = vld [vmem:[#allocation5 + $0x198] sm:$0xff]  ;;  %v176_v54 = vld [vmem:[#allocation5 + $0x190] sm:$0xff]  ;;  %v127_v57 = vld [vmem:[#allocation5 + $0x8] sm:$0xff] }
  0x5d   :  { %976 = vmatprep.subr.mxu1 %v181_v34  ;;  %943 = vmatprep.subr.mxu0 %v148_v35  ;;  %v161_v52 = vld [vmem:[#allocation5 + $0x118] sm:$0xff]  ;;  %v160_v56 = vld [vmem:[#allocation5 + $0x110] sm:$0xff]  ;;  %v175_v58 = vld [vmem:[#allocation5 + $0x188] sm:$0xff] }
  0x5e   :  { %977 = vmatpush3.msra.mxu1 %v165_v36  ;;  %944 = vmatpush3.msra.mxu0 %v132_v37  ;;  %v142_v59 = vld [vmem:[#allocation5 + $0x80] sm:$0xff]  ;;  %v120_v60 = vld [vmem:[#allocation2 + $0x8] sm:$0xff]  ;;  %v159_v62 = vld [vmem:[#allocation5 + $0x108] sm:$0xff] }
  0x5f   :  { %978 = vmatprep.subr.mxu1 %v180_v38  ;;  %945 = vmatprep.subr.mxu0 %v147_v39  ;;  %v126_v61 = vld [vmem:[#allocation5] sm:$0xff]  ;;  %v119_v63 = vld [vmem:[#allocation2] sm:$0xff]  ;;  %v221_v1 = vld [vmem:[#allocation5 + $0x2f8] sm:$0xff] }
  0x60   :  { %979 = vmatpush3.msra.mxu1 %v164_v40  ;;  %946 = vmatpush3.msra.mxu0 %v131_v41  ;;  %v174_v0 = vld [vmem:[#allocation5 + $0x180] sm:$0xff]  ;;  %v205_v4 = vld [vmem:[#allocation5 + $0x278] sm:$0xff]  ;;  %v220_v6 = vld [vmem:[#allocation5 + $0x2f0] sm:$0xff] }
  0x61   :  { %980 = vmatprep.subr.mxu1 %v179_v42  ;;  %947 = vmatprep.subr.mxu0 %v146_v43  ;;  %v158_v2 = vld [vmem:[#allocation5 + $0x100] sm:$0xff]  ;;  %v121_v5 = vld [vmem:[#allocation2 + $0x10] sm:$0xff]  ;;  %v204_v7 = vld [vmem:[#allocation5 + $0x270] sm:$0xff] }
  0x62   :  { %981 = vmatpush3.msra.mxu1 %v163_v44  ;;  %948 = vmatpush3.msra.mxu0 %v130_v45  ;;  %v122_v3 = vld [vmem:[#allocation2 + $0x18] sm:$0xff]  ;;  %v219_v8 = vld [vmem:[#allocation5 + $0x2e8] sm:$0xff]  ;;  %v237_v9 = vld [vmem:[#allocation5 + $0x378] sm:$0xff] }
  0x63   :  { %982 = vmatprep.subr.mxu1 %v178_v46  ;;  %949 = vmatprep.subr.mxu0 %v145_v47  ;;  %v203_v10 = vld [vmem:[#allocation5 + $0x268] sm:$0xff]  ;;  %v218_v12 = vld [vmem:[#allocation5 + $0x2e0] sm:$0xff]  ;;  %v236_v13 = vld [vmem:[#allocation5 + $0x370] sm:$0xff] }
  0x64   :  { %983 = vmatpush3.msra.mxu1 %v162_v48  ;;  %950 = vmatpush3.msra.mxu0 %v129_v49  ;;  %v202_v14 = vld [vmem:[#allocation5 + $0x260] sm:$0xff]  ;;  %v217_v15 = vld [vmem:[#allocation5 + $0x2d8] sm:$0xff]  ;;  %v235_v16 = vld [vmem:[#allocation5 + $0x368] sm:$0xff] }
  0x65   :  { %984 = vmatprep.subr.mxu1 %v177_v50  ;;  %951 = vmatprep.subr.mxu0 %v144_v51  ;;  %v201_v17 = vld [vmem:[#allocation5 + $0x258] sm:$0xff]  ;;  %v216_v18 = vld [vmem:[#allocation5 + $0x2d0] sm:$0xff]  ;;  %v234_v19 = vld [vmem:[#allocation5 + $0x360] sm:$0xff] }
  0x66   :  { %985 = vmatpush3.msra.mxu1 %v161_v52  ;;  %952 = vmatpush3.msra.mxu0 %v128_v53  ;;  %v200_v20 = vld [vmem:[#allocation5 + $0x250] sm:$0xff]  ;;  %v215_v21 = vld [vmem:[#allocation5 + $0x2c8] sm:$0xff]  ;;  %v233_v22 = vld [vmem:[#allocation5 + $0x358] sm:$0xff] }
  0x67   :  { %986 = vmatprep.subr.mxu1 %v176_v54  ;;  %953 = vmatprep.subr.mxu0 %v143_v55  ;;  %v199_v23 = vld [vmem:[#allocation5 + $0x248] sm:$0xff]  ;;  %v214_v24 = vld [vmem:[#allocation5 + $0x2c0] sm:$0xff]  ;;  %v232_v25 = vld [vmem:[#allocation5 + $0x350] sm:$0xff] }
  0x68   :  { %987 = vmatpush3.msra.mxu1 %v160_v56  ;;  %954 = vmatpush3.msra.mxu0 %v127_v57  ;;  %v198_v26 = vld [vmem:[#allocation5 + $0x240] sm:$0xff]  ;;  %v213_v27 = vld [vmem:[#allocation5 + $0x2b8] sm:$0xff]  ;;  %v231_v28 = vld [vmem:[#allocation5 + $0x348] sm:$0xff] }
  0x69   :  { %988 = vmatprep.subr.mxu1 %v175_v58  ;;  %955 = vmatprep.subr.mxu0 %v142_v59  ;;  %v197_v29 = vld [vmem:[#allocation5 + $0x238] sm:$0xff]  ;;  %v212_v30 = vld [vmem:[#allocation5 + $0x2b0] sm:$0xff]  ;;  %v230_v31 = vld [vmem:[#allocation5 + $0x340] sm:$0xff] }
  0x6a   :  { %309 = vmatprep.mubr.f32.mxu0 %v120_v60  ;;  %956 = vmatpush3.msra.mxu0 %v126_v61  ;;  %v196_v32 = vld [vmem:[#allocation5 + $0x230] sm:$0xff]  ;;  %v211_v33 = vld [vmem:[#allocation5 + $0x2a8] sm:$0xff]  ;;  %v229_v34 = vld [vmem:[#allocation5 + $0x338] sm:$0xff] }
  0x6b   :  { %989 = vmatpush3.msra.mxu1 %v159_v62  ;;  %310 = vmatmul.mubr.f32.vlgmr.msra.gmra.mxu0 %v119_v63  ;;  %v195_v35 = vld [vmem:[#allocation5 + $0x228] sm:$0xff]  ;;  %v210_v36 = vld [vmem:[#allocation5 + $0x2a0] sm:$0xff]  ;;  %v228_v37 = vld [vmem:[#allocation5 + $0x330] sm:$0xff] }
  0x6c   :  { %990 = vmatprep.subr.mxu1 %v174_v0  ;;  %995 = vmatprep.subr.mxu0 %v221_v1  ;;  %v194_v38 = vld [vmem:[#allocation5 + $0x220] sm:$0xff]  ;;  %v209_v39 = vld [vmem:[#allocation5 + $0x298] sm:$0xff]  ;;  %v227_v40 = vld [vmem:[#allocation5 + $0x328] sm:$0xff] }
  0x6d   :  { %991 = vmatpush3.msra.mxu1 %v158_v2  ;;  %379 = vmatprep.mubr.f32.mxu1 %v122_v3  ;;  %v193_v41 = vld [vmem:[#allocation5 + $0x218] sm:$0xff]  ;;  %v208_v42 = vld [vmem:[#allocation5 + $0x290] sm:$0xff]  ;;  %v226_v43 = vld [vmem:[#allocation5 + $0x320] sm:$0xff] }
  0x6e   :  { %996 = vmatpush3.msra.mxu0 %v205_v4  ;;  %380 = vmatmul.mubr.f32.vlgmr.msra.gmra.mxu1 %v121_v5  ;;  %v192_v44 = vld [vmem:[#allocation5 + $0x210] sm:$0xff]  ;;  %v207_v45 = vld [vmem:[#allocation5 + $0x288] sm:$0xff]  ;;  %v225_v46 = vld [vmem:[#allocation5 + $0x318] sm:$0xff] }
  0x6f   :  { %997 = vmatprep.subr.mxu0 %v220_v6  ;;  %1115 = vmatprep.subr.mxu1 %v1459_v11  ;;  %v191_v47 = vld [vmem:[#allocation5 + $0x208] sm:$0xff]  ;;  %v206_v48 = vld [vmem:[#allocation5 + $0x280] sm:$0xff]  ;;  %v124_v49 = vld [vmem:[#allocation2 + $0x28] sm:$0xff] }
  0x70   :  { %998 = vmatpush3.msra.mxu0 %v204_v7  ;;  %1116 = vmatpush3.msra.mxu1 %v237_v9  ;;  %v190_v50 = vld [vmem:[#allocation5 + $0x200] sm:$0xff]  ;;  %v224_v51 = vld [vmem:[#allocation5 + $0x310] sm:$0xff]  ;;  %v123_v52 = vld [vmem:[#allocation2 + $0x20] sm:$0xff] }
  0x71   :  { %999 = vmatprep.subr.mxu0 %v219_v8  ;;  %1117 = vmatprep.subr.mxu1 %v1459_v11  ;;  %v223_v53 = vld [vmem:[#allocation5 + $0x308] sm:$0xff]  ;;  %v222_v54 = vld [vmem:[#allocation5 + $0x300] sm:$0xff]  ;;  %v125_v55 = vld [vmem:[#allocation2 + $0x30] sm:$0xff] }
  0x72   :  { %1000 = vmatpush3.msra.mxu0 %v203_v10  ;;  %1118 = vmatpush3.msra.mxu1 %v236_v13  ;;  %v541_v56 = vld [vmem:[#allocation7 + $0x78] sm:$0xff]  ;;  %v540_v57 = vld [vmem:[#allocation7 + $0x70] sm:$0xff]  ;;  %v539_v58 = vld [vmem:[#allocation7 + $0x68] sm:$0xff] }
  0x73   :  { %1001 = vmatprep.subr.mxu0 %v218_v12  ;;  %1119 = vmatprep.subr.mxu1 %v1459_v11  ;;  %v538_v59 = vld [vmem:[#allocation7 + $0x60] sm:$0xff]  ;;  %v537_v60 = vld [vmem:[#allocation7 + $0x58] sm:$0xff]  ;;  %v536_v61 = vld [vmem:[#allocation7 + $0x50] sm:$0xff] }
  0x74   :  { %1002 = vmatpush3.msra.mxu0 %v202_v14  ;;  %1120 = vmatpush3.msra.mxu1 %v235_v16  ;;  %v535_v62 = vld [vmem:[#allocation7 + $0x48] sm:$0xff]  ;;  %v534_v63 = vld [vmem:[#allocation7 + $0x40] sm:$0xff]  ;;  %v533_v0 = vld [vmem:[#allocation7 + $0x38] sm:$0xff] }
  0x75   :  { %1003 = vmatprep.subr.mxu0 %v217_v15  ;;  %1121 = vmatprep.subr.mxu1 %v1459_v11  ;;  %v532_v1 = vld [vmem:[#allocation7 + $0x30] sm:$0xff]  ;;  %v531_v2 = vld [vmem:[#allocation7 + $0x28] sm:$0xff]  ;;  %v530_v3 = vld [vmem:[#allocation7 + $0x20] sm:$0xff] }
  0x76   :  { %1004 = vmatpush3.msra.mxu0 %v201_v17  ;;  %1122 = vmatpush3.msra.mxu1 %v234_v19  ;;  %v529_v4 = vld [vmem:[#allocation7 + $0x18] sm:$0xff]  ;;  %v528_v5 = vld [vmem:[#allocation7 + $0x10] sm:$0xff]  ;;  %v527_v6 = vld [vmem:[#allocation7 + $0x8] sm:$0xff] }
  0x77   :  { %1005 = vmatprep.subr.mxu0 %v216_v18  ;;  %1123 = vmatprep.subr.mxu1 %v1459_v11  ;;  %v526_v7 = vld [vmem:[#allocation7] sm:$0xff]  ;;  %v635_v8 = vld [vmem:[#allocation8 + $0x78] sm:$0xff]  ;;  %v634_v9 = vld [vmem:[#allocation8 + $0x70] sm:$0xff] }
  0x78   :  { %1006 = vmatpush3.msra.mxu0 %v200_v20  ;;  %1124 = vmatpush3.msra.mxu1 %v233_v22  ;;  %v633_v10 = vld [vmem:[#allocation8 + $0x68] sm:$0xff]  ;;  %v632_v12 = vld [vmem:[#allocation8 + $0x60] sm:$0xff]  ;;  %v631_v13 = vld [vmem:[#allocation8 + $0x58] sm:$0xff] }
  0x79   :  { %1007 = vmatprep.subr.mxu0 %v215_v21  ;;  %1125 = vmatprep.subr.mxu1 %v1459_v11  ;;  %v630_v14 = vld [vmem:[#allocation8 + $0x50] sm:$0xff]  ;;  %v629_v15 = vld [vmem:[#allocation8 + $0x48] sm:$0xff]  ;;  %v628_v16 = vld [vmem:[#allocation8 + $0x40] sm:$0xff] }
  0x7a   :  { %1008 = vmatpush3.msra.mxu0 %v199_v23  ;;  %1126 = vmatpush3.msra.mxu1 %v232_v25  ;;  %v627_v17 = vld [vmem:[#allocation8 + $0x38] sm:$0xff]  ;;  %v626_v18 = vld [vmem:[#allocation8 + $0x30] sm:$0xff]  ;;  %v625_v19 = vld [vmem:[#allocation8 + $0x28] sm:$0xff] }
  0x7b   :  { %1009 = vmatprep.subr.mxu0 %v214_v24  ;;  %1127 = vmatprep.subr.mxu1 %v1459_v11  ;;  %v624_v20 = vld [vmem:[#allocation8 + $0x20] sm:$0xff]  ;;  %v623_v21 = vld [vmem:[#allocation8 + $0x18] sm:$0xff] }
  0x7c   :  { %1010 = vmatpush3.msra.mxu0 %v198_v26  ;;  %1128 = vmatpush3.msra.mxu1 %v231_v28  ;;  %v920_v26 = vld [vmem:[%s1665_s2] ss:$0 sm:$0xff] }
  0x7d   :  { %1011 = vmatprep.subr.mxu0 %v213_v27  ;;  %1129 = vmatprep.subr.mxu1 %v1459_v11 }
  0x7e   :  { %1012 = vmatpush3.msra.mxu0 %v197_v29  ;;  %1130 = vmatpush3.msra.mxu1 %v230_v31 }
  0x7f   :  { %1013 = vmatprep.subr.mxu0 %v212_v30  ;;  %1131 = vmatprep.subr.mxu1 %v1459_v11 }
  0x80   :  { %1014 = vmatpush3.msra.mxu0 %v196_v32  ;;  %1132 = vmatpush3.msra.mxu1 %v229_v34 }
  0x81   :  { %1015 = vmatprep.subr.mxu0 %v211_v33  ;;  %1133 = vmatprep.subr.mxu1 %v1459_v11 }
  0x82   :  { %1016 = vmatpush3.msra.mxu0 %v195_v35  ;;  %1134 = vmatpush3.msra.mxu1 %v228_v37 }
  0x83   :  { %1017 = vmatprep.subr.mxu0 %v210_v36  ;;  %1135 = vmatprep.subr.mxu1 %v1459_v11 }
  0x84   :  { %1018 = vmatpush3.msra.mxu0 %v194_v38  ;;  %1136 = vmatpush3.msra.mxu1 %v227_v40  ;;  %v621_v40 = vld [vmem:[#allocation8 + $0x8] sm:$0xff] }
  0x85   :  { %1019 = vmatprep.subr.mxu0 %v209_v39  ;;  %1137 = vmatprep.subr.mxu1 %v1459_v11  ;;  %v622_v39 = vld [vmem:[#allocation8 + $0x10] sm:$0xff] }
  0x86   :  { %1020 = vmatpush3.msra.mxu0 %v193_v41  ;;  %1138 = vmatpush3.msra.mxu1 %v226_v43  ;;  %v620_v41 = vld [vmem:[#allocation8] sm:$0xff]  ;;  %v728_v43 = vld [vmem:[#allocation10 + $0x70] sm:$0xff] }
  0x87   :  { %1021 = vmatprep.subr.mxu0 %v208_v42  ;;  %1139 = vmatprep.subr.mxu1 %v1459_v11  ;;  %v729_v42 = vld [vmem:[#allocation10 + $0x78] sm:$0xff] }
  0x88   :  { %1022 = vmatpush3.msra.mxu0 %v192_v44  ;;  %1140 = vmatpush3.msra.mxu1 %v225_v46  ;;  %v727_v44 = vld [vmem:[#allocation10 + $0x68] sm:$0xff]  ;;  %v725_v46 = vld [vmem:[#allocation10 + $0x58] sm:$0xff] }
  0x89   :  { %1023 = vmatprep.subr.mxu0 %v207_v45  ;;  %1141 = vmatprep.subr.mxu1 %v1459_v11  ;;  %v726_v45 = vld [vmem:[#allocation10 + $0x60] sm:$0xff] }
  0x8a   :  { %1024 = vmatpush3.msra.mxu0 %v191_v47  ;;  %449 = vmatprep.mubr.f32.mxu0 %v124_v49  ;;  %v724_v47 = vld [vmem:[#allocation10 + $0x50] sm:$0xff]  ;;  %v722_v49 = vld [vmem:[#allocation10 + $0x40] sm:$0xff] }
  0x8b   :  { %1025 = vmatprep.subr.mxu0 %v206_v48  ;;  %1142 = vmatpush3.msra.mxu1 %v224_v51  ;;  %v723_v48 = vld [vmem:[#allocation10 + $0x48] sm:$0xff]  ;;  %v720_v51 = vld [vmem:[#allocation10 + $0x30] sm:$0xff] }
  0x8c   :  { %1026 = vmatpush3.msra.mxu0 %v190_v50  ;;  %1143 = vmatprep.subr.mxu1 %v1459_v11  ;;  %v721_v50 = vld [vmem:[#allocation10 + $0x38] sm:$0xff] }
  0x8d   :  { %450 = vmatmul.mubr.f32.vlgmr.msra.gmra.mxu0 %v123_v52  ;;  %1144 = vmatpush3.msra.mxu1 %v223_v53  ;;  %v719_v52 = vld [vmem:[#allocation10 + $0x28] sm:$0xff]  ;;  %v718_v53 = vld [vmem:[#allocation10 + $0x20] sm:$0xff] }
  0x8e   :  { %1147 = vmatprep.mubr.msk.f32.mxu1 %vm1460_vm0, %v1459_v11  ;;  %1145 = vmatprep.subr.mxu1 %v1459_v11 }
  0x8f   :  { %1150 = vmatprep.subr.mxu0 %v1459_v11  ;;  %1146 = vmatpush3.msra.mxu1 %v222_v54  ;;  %v717_v54 = vld [vmem:[#allocation10 + $0x18] sm:$0xff] }
  0x90   :  { %1182 = vmatprep.mubr.msk.f32.mxu0 %vm1460_vm0, %v1459_v11  ;;  %1148 = vmatmul.mubr.f32.vlgmr.msra.gmra.mxu1 %v125_v55  ;;  %v921_v55 = vld [vmem:[%s1667_s4] ss:$0 sm:$0xff] }
  0x91   :  { %1185 = vmatprep.subr.mxu1 %v1459_v11  ;;  %1217 = vmatprep.mubr.msk.f32.mxu1 %vm1460_vm0, %v1459_v11 }
  0x92   :  { %1151 = vmatpush3.msra.mxu0 %v541_v56  ;;  %1186 = vmatpush3.msra.mxu1 %v635_v8  ;;  %v814_v8 = vld [vmem:[#allocation11 + $0x30] sm:$0xff] }
  0x93   :  { %1152 = vmatprep.subr.mxu0 %v1459_v11  ;;  %1187 = vmatprep.subr.mxu1 %v1459_v11 }
  0x94   :  { %1153 = vmatpush3.msra.mxu0 %v540_v57  ;;  %1188 = vmatpush3.msra.mxu1 %v634_v9  ;;  %v813_v9 = vld [vmem:[#allocation11 + $0x28] sm:$0xff] }
  0x95   :  { %1154 = vmatprep.subr.mxu0 %v1459_v11  ;;  %1189 = vmatprep.subr.mxu1 %v1459_v11 }
  0x96   :  { %1155 = vmatpush3.msra.mxu0 %v539_v58  ;;  %1190 = vmatpush3.msra.mxu1 %v633_v10  ;;  %v812_v10 = vld [vmem:[#allocation11 + $0x20] sm:$0xff] }
  0x97   :  { %1156 = vmatprep.subr.mxu0 %v1459_v11  ;;  %1191 = vmatprep.subr.mxu1 %v1459_v11 }
  0x98   :  { %1157 = vmatpush3.msra.mxu0 %v538_v59  ;;  %1192 = vmatpush3.msra.mxu1 %v632_v12  ;;  %v811_v12 = vld [vmem:[#allocation11 + $0x18] sm:$0xff] }
  0x99   :  { %1158 = vmatprep.subr.mxu0 %v1459_v11  ;;  %1193 = vmatprep.subr.mxu1 %v1459_v11 }
  0x9a   :  { %1159 = vmatpush3.msra.mxu0 %v537_v60  ;;  %1194 = vmatpush3.msra.mxu1 %v631_v13  ;;  %v716_v60 = vld [vmem:[#allocation10 + $0x10] sm:$0xff]  ;;  %v922_v13 = vld [vmem:[%s1669_s6] ss:$0 sm:$0xff] }
  0x9b   :  { %1160 = vmatprep.subr.mxu0 %v1459_v11  ;;  %1195 = vmatprep.subr.mxu1 %v1459_v11 }
  0x9c   :  { %1161 = vmatpush3.msra.mxu0 %v536_v61  ;;  %1196 = vmatpush3.msra.mxu1 %v630_v14  ;;  %v715_v61 = vld [vmem:[#allocation10 + $0x8] sm:$0xff] }
  0x9d   :  { %1162 = vmatprep.subr.mxu0 %v1459_v11  ;;  %1197 = vmatprep.subr.mxu1 %v1459_v11 }
  0x9e   :  { %1163 = vmatpush3.msra.mxu0 %v535_v62  ;;  %1198 = vmatpush3.msra.mxu1 %v629_v15  ;;  %v714_v62 = vld [vmem:[#allocation10] sm:$0xff] }
  0x9f   :  { %1164 = vmatprep.subr.mxu0 %v1459_v11  ;;  %1199 = vmatprep.subr.mxu1 %v1459_v11 }
  0xa0   :  { %1165 = vmatpush3.msra.mxu0 %v534_v63  ;;  %1200 = vmatpush3.msra.mxu1 %v628_v16  ;;  %v823_v63 = vld [vmem:[#allocation11 + $0x78] sm:$0xff] }
  0xa1   :  { %1166 = vmatprep.subr.mxu0 %v1459_v11  ;;  %1201 = vmatprep.subr.mxu1 %v1459_v11 }
  0xa2   :  { %1167 = vmatpush3.msra.mxu0 %v533_v0  ;;  %1202 = vmatpush3.msra.mxu1 %v627_v17  ;;  %v822_v0 = vld [vmem:[#allocation11 + $0x70] sm:$0xff] }
  0xa3   :  { %1168 = vmatprep.subr.mxu0 %v1459_v11  ;;  %1203 = vmatprep.subr.mxu1 %v1459_v11 }
  0xa4   :  { %1169 = vmatpush3.msra.mxu0 %v532_v1  ;;  %1204 = vmatpush3.msra.mxu1 %v626_v18  ;;  %v821_v1 = vld [vmem:[#allocation11 + $0x68] sm:$0xff]  ;;  %v810_v18 = vld [vmem:[#allocation11 + $0x10] sm:$0xff] }
  0xa5   :  { %1170 = vmatprep.subr.mxu0 %v1459_v11  ;;  %1205 = vmatprep.subr.mxu1 %v1459_v11 }
  0xa6   :  { %1171 = vmatpush3.msra.mxu0 %v531_v2  ;;  %1206 = vmatpush3.msra.mxu1 %v625_v19  ;;  %v820_v2 = vld [vmem:[#allocation11 + $0x60] sm:$0xff]  ;;  %v809_v19 = vld [vmem:[#allocation11 + $0x8] sm:$0xff] }
  0xa7   :  { %1172 = vmatprep.subr.mxu0 %v1459_v11  ;;  %1207 = vmatprep.subr.mxu1 %v1459_v11 }
  0xa8   :  { %1173 = vmatpush3.msra.mxu0 %v530_v3  ;;  %1208 = vmatpush3.msra.mxu1 %v624_v20  ;;  %v819_v3 = vld [vmem:[#allocation11 + $0x58] sm:$0xff]  ;;  %v808_v20 = vld [vmem:[#allocation11] sm:$0xff] }
  0xa9   :  { %1174 = vmatprep.subr.mxu0 %v1459_v11  ;;  %1209 = vmatprep.subr.mxu1 %v1459_v11 }
  0xaa   :  { %1175 = vmatpush3.msra.mxu0 %v529_v4  ;;  %1210 = vmatpush3.msra.mxu1 %v623_v21  ;;  %v818_v4 = vld [vmem:[#allocation11 + $0x50] sm:$0xff]  ;;  %v923_v21 = vld [vmem:[%s1671_s8] ss:$0 sm:$0xff] }
  0xab   :  { %1176 = vmatprep.subr.mxu0 %v1459_v11  ;;  %1211 = vmatprep.subr.mxu1 %v1459_v11 }
  0xac   :  { %1177 = vmatpush3.msra.mxu0 %v528_v5  ;;  %1212 = vmatpush3.msra.mxu1 %v622_v39  ;;  %v817_v5 = vld [vmem:[#allocation11 + $0x48] sm:$0xff] }
  0xad   :  { %1178 = vmatprep.subr.mxu0 %v1459_v11  ;;  %1213 = vmatprep.subr.mxu1 %v1459_v11 }
  0xae   :  { %1179 = vmatpush3.msra.mxu0 %v527_v6  ;;  %1214 = vmatpush3.msra.mxu1 %v621_v40  ;;  %v816_v6 = vld [vmem:[#allocation11 + $0x40] sm:$0xff] }
  0xaf   :  { %1180 = vmatprep.subr.mxu0 %v1459_v11  ;;  %1215 = vmatprep.subr.mxu1 %v1459_v11 }
  0xb0   :  { %1181 = vmatpush3.msra.mxu0 %v526_v7  ;;  %1216 = vmatpush3.msra.mxu1 %v620_v41  ;;  %v815_v7 = vld [vmem:[#allocation11 + $0x38] sm:$0xff] }
  0xb1   :  { %1220 = vmatprep.subr.mxu0 %v1459_v11  ;;  %1255 = vmatprep.subr.mxu1 %v1459_v11 }
 0x12b   :  { %v957_v22 = vpop.f32.mrf.mxu0 }
 0x12d   :  { %v958_v23 = vpop.f32.mrf.mxu0 }
 0x12e   :  { %v992_v24 = vpop.f32.mrf.mxu1  ;;  %v959_v25 = vadd.f32 %v958_v23, %v957_v22 }
 0x130   :  { %v993_v27 = vpop.f32.mrf.mxu1  ;;  %v312_v28 = vadd.f32 %v959_v25, %v920_v26  ;;  %v924_v26 = vld [vmem:[%s1673_s10] ss:$0 sm:$0xff] }
 0x131   :  { %v994_v29 = vadd.f32 %v993_v27, %v992_v24 }
 0x133   :  { %v382_v32 = vadd.f32 %v994_v29, %v312_v28 }
 0x14d   :  { %v1027_v30 = vpop.f32.mrf.mxu0 }
 0x14f   :  { %v1028_v31 = vpop.f32.mrf.mxu0 }
 0x150   :  { %v1029_v33 = vadd.f32 %v1028_v31, %v1027_v30  ;;  %v521_v34 = vpop.f32.mrf.mxu1 }
 0x152   :  { %v452_v35 = vadd.f32 %v1029_v33, %v382_v32  ;;  %v1149_v36 = vpop.f32.mrf.mxu1 }
 0x154   :  { %v522_v37 = vadd.f32 %v521_v34, %v452_v35 }
 0x156   :  { %v525_v38 = vmax.f32 %v522_v37, 0.0 }
 0x158   :  { %1183 = vmatmul.mubr.f32.vlgmr.msra.gmra.mxu0 %v525_v38 }
 0x159   :  { %1252 = vmatprep.mubr.msk.f32.mxu0 %vm1460_vm0, %v1459_v11  ;;  %1221 = vmatpush3.msra.mxu0 %v729_v42 }
 0x15a   :  { %1222 = vmatprep.subr.mxu0 %v1459_v11 }
 0x15b   :  { %1223 = vmatpush3.msra.mxu0 %v728_v43 }
 0x15c   :  { %1224 = vmatprep.subr.mxu0 %v1459_v11 }
 0x15d   :  { %1225 = vmatpush3.msra.mxu0 %v727_v44 }
 0x15e   :  { %1226 = vmatprep.subr.mxu0 %v1459_v11 }
 0x15f   :  { %1227 = vmatpush3.msra.mxu0 %v726_v45 }
 0x160   :  { %1228 = vmatprep.subr.mxu0 %v1459_v11 }
 0x161   :  { %1229 = vmatpush3.msra.mxu0 %v725_v46 }
 0x162   :  { %1230 = vmatprep.subr.mxu0 %v1459_v11 }
 0x163   :  { %1231 = vmatpush3.msra.mxu0 %v724_v47 }
 0x164   :  { %1232 = vmatprep.subr.mxu0 %v1459_v11 }
 0x165   :  { %1233 = vmatpush3.msra.mxu0 %v723_v48 }
 0x166   :  { %1234 = vmatprep.subr.mxu0 %v1459_v11 }
 0x167   :  { %1235 = vmatpush3.msra.mxu0 %v722_v49 }
 0x168   :  { %1236 = vmatprep.subr.mxu0 %v1459_v11 }
 0x169   :  { %1237 = vmatpush3.msra.mxu0 %v721_v50 }
 0x16a   :  { %1238 = vmatprep.subr.mxu0 %v1459_v11 }
 0x16b   :  { %1239 = vmatpush3.msra.mxu0 %v720_v51 }
 0x16c   :  { %1240 = vmatprep.subr.mxu0 %v1459_v11 }
 0x16d   :  { %1241 = vmatpush3.msra.mxu0 %v719_v52 }
 0x16e   :  { %1242 = vmatprep.subr.mxu0 %v1459_v11 }
 0x16f   :  { %1243 = vmatpush3.msra.mxu0 %v718_v53 }
 0x170   :  { %1244 = vmatprep.subr.mxu0 %v1459_v11 }
 0x171   :  { %1245 = vmatpush3.msra.mxu0 %v717_v54 }
 0x172   :  { %1246 = vmatprep.subr.mxu0 %v1459_v11 }
 0x173   :  { %1247 = vmatpush3.msra.mxu0 %v716_v60 }
 0x174   :  { %1248 = vmatprep.subr.mxu0 %v1459_v11 }
 0x175   :  { %1249 = vmatpush3.msra.mxu0 %v715_v61 }
 0x176   :  { %1250 = vmatprep.subr.mxu0 %v1459_v11 }
 0x177   :  { %1251 = vmatpush3.msra.mxu0 %v714_v62 }
 0x218   :  { %v615_v56 = vpop.f32.mrf.mxu0 }
 0x219   :  { %v616_v57 = vadd.f32 %v921_v55, %v615_v56 }
 0x21a   :  { %v1184_v58 = vpop.f32.mrf.mxu0 }
 0x21b   :  { %v619_v59 = vmax.f32 %v616_v57, 0.0 }
 0x21d   :  { %1218 = vmatmul.mubr.f32.vlgmr.msra.gmra.mxu1 %v619_v59 }
 0x21e   :  { %1287 = vmatprep.mubr.msk.f32.mxu1 %vm1460_vm0, %v1459_v11  ;;  %1256 = vmatpush3.msra.mxu1 %v823_v63 }
 0x21f   :  { %1257 = vmatprep.subr.mxu1 %v1459_v11 }
 0x220   :  { %1258 = vmatpush3.msra.mxu1 %v822_v0 }
 0x221   :  { %1259 = vmatprep.subr.mxu1 %v1459_v11 }
 0x222   :  { %1260 = vmatpush3.msra.mxu1 %v821_v1 }
 0x223   :  { %1261 = vmatprep.subr.mxu1 %v1459_v11 }
 0x224   :  { %1262 = vmatpush3.msra.mxu1 %v820_v2 }
 0x225   :  { %1263 = vmatprep.subr.mxu1 %v1459_v11 }
 0x226   :  { %1264 = vmatpush3.msra.mxu1 %v819_v3 }
 0x227   :  { %1265 = vmatprep.subr.mxu1 %v1459_v11 }
 0x228   :  { %1266 = vmatpush3.msra.mxu1 %v818_v4 }
 0x229   :  { %1267 = vmatprep.subr.mxu1 %v1459_v11 }
 0x22a   :  { %1268 = vmatpush3.msra.mxu1 %v817_v5 }
 0x22b   :  { %1269 = vmatprep.subr.mxu1 %v1459_v11 }
 0x22c   :  { %1270 = vmatpush3.msra.mxu1 %v816_v6 }
 0x22d   :  { %1271 = vmatprep.subr.mxu1 %v1459_v11 }
 0x22e   :  { %1272 = vmatpush3.msra.mxu1 %v815_v7 }
 0x22f   :  { %1273 = vmatprep.subr.mxu1 %v1459_v11 }
 0x230   :  { %1274 = vmatpush3.msra.mxu1 %v814_v8 }
 0x231   :  { %1275 = vmatprep.subr.mxu1 %v1459_v11 }
 0x232   :  { %1276 = vmatpush3.msra.mxu1 %v813_v9 }
 0x233   :  { %1277 = vmatprep.subr.mxu1 %v1459_v11 }
 0x234   :  { %1278 = vmatpush3.msra.mxu1 %v812_v10 }
 0x235   :  { %1279 = vmatprep.subr.mxu1 %v1459_v11 }
 0x236   :  { %1280 = vmatpush3.msra.mxu1 %v811_v12 }
 0x237   :  { %1281 = vmatprep.subr.mxu1 %v1459_v11 }
 0x238   :  { %1282 = vmatpush3.msra.mxu1 %v810_v18 }
 0x239   :  { %1283 = vmatprep.subr.mxu1 %v1459_v11 }
 0x23a   :  { %1284 = vmatpush3.msra.mxu1 %v809_v19 }
 0x23b   :  { %1285 = vmatprep.subr.mxu1 %v1459_v11 }
 0x23c   :  { %1286 = vmatpush3.msra.mxu1 %v808_v20 }
 0x2dd   :  { %v709_v14 = vpop.f32.mrf.mxu1 }
 0x2de   :  { %v710_v15 = vadd.f32 %v922_v13, %v709_v14 }
 0x2df   :  { %v1219_v16 = vpop.f32.mrf.mxu1 }
 0x2e0   :  { %v713_v17 = vmax.f32 %v710_v15, 0.0 }
 0x2e2   :  { %1253 = vmatmul.mubr.f32.vlgmr.msra.gmra.mxu0 %v713_v17 }
 0x3a2   :  { %v803_v22 = vpop.f32.mrf.mxu0 }
 0x3a3   :  { %v804_v23 = vadd.f32 %v923_v21, %v803_v22 }
 0x3a4   :  { %v1254_v24 = vpop.f32.mrf.mxu0 }
 0x3a5   :  { %v807_v25 = vmax.f32 %v804_v23, 0.0 }
 0x3a7   :  { %1288 = vmatmul.mubr.f32.vlgmr.msra.gmra.mxu1 %v807_v25 }
 0x467   :  { %v897_v27 = vpop.f32.mrf.mxu1 }
 0x468   :  { %v898_v28 = vadd.f32 %v924_v26, %v897_v27 }
 0x469   :  { %v1289_v11 = vpop.f32.mrf.mxu1 }
 0x46a   :  { %901 = vst [vmem:[#allocation13] sm:$0xff] %v898_v28 }
 0x46b   :  { %1432 = shalt.err (!%p1429_p6)
}
 0x46c   :  { %911 = dma.vmem_to_hbm [thread:$0]  %s909_s12, 128, %s1674_s11, [#allocation4]  }
 0x46d   :  { %1449 = dma.done.wait [#allocation4], 128  }
 0x46e   :  { %1450 = vsyncadd [#allocation4], 4294967168 }
 0x46f   :  { %915 = vsyncpa [#allocation3], 1 }
 0x470   :  { %916 = vsyncpa [#allocation6], 1 }
 0x471   :  { %917 = vsyncpa [#allocation9], 1 }
 0x472   :  { %918 = vsyncpa [#allocation12], 1 }
 0x473   :  { %919 = vsyncpa [#allocation4], 1 }

</bundles_post_ra>
